<compile_context>
chip_gen: v7x
topology: tpu7x:2x2x1
jax: 0.10.0
libtpu: 0.0.40
codegen_flags: <defaults>
</compile_context>

<pallas_src>
import jax
import jax.numpy as jnp
from jax.experimental import pallas as pl
from jax.experimental.pallas import tpu as pltpu


def _make_head_kernel(s_total, ts):
    """Kernel closure over the static true sequence length and S tile size."""
    needs_mask = (s_total % ts) != 0
    inv_s = 1.0 / float(s_total)

    def kernel(x_ref, w_ref, b_ref, o_ref, acc_ref):
        # x_ref: (TB, TS, D), w_ref: (D, C), b_ref: (1, C),
        # o_ref: (TB, 1, C), acc_ref: VMEM (TB, D) f32
        j = pl.program_id(1)
        last = pl.num_programs(1) - 1

        @pl.when(j == 0)
        def _():
            acc_ref[...] = jnp.zeros_like(acc_ref)

        def accumulate(xt):
            # Per-tile sequence reduction into the f32 accumulator.
            acc_ref[...] += xt.astype(jnp.float32).sum(axis=1)

        if needs_mask:
            # Only the final S tile can contain padding rows: keep the
            # iota/compare/select entirely off the hot streaming steps.
            @pl.when(j != last)
            def _():
                accumulate(x_ref[...])

            @pl.when(j == last)
            def _():
                xt = x_ref[...]
                ts_ = xt.shape[1]
                row = jax.lax.broadcasted_iota(jnp.int32, (ts_, 1), 0)
                valid = (j * ts_ + row) < s_total          # (TS, 1)
                accumulate(jnp.where(valid[None, :, :], xt, jnp.zeros_like(xt)))
        else:
            accumulate(x_ref[...])

        @pl.when(j == last)
        def _():
            pooled_sum = acc_ref[...]                      # (TB, D) f32 sum
            w = w_ref[...]                                 # (D, C) native dtype
            if w_ref.dtype != jnp.float32:
                # Feed the MXU its native operand (avoids a full (D,C) VPU
                # cast for bf16 heads); accumulation stays in f32.
                lhs = pooled_sum.astype(w_ref.dtype)
            else:
                lhs = pooled_sum
            logits = jnp.dot(lhs, w, preferred_element_type=jnp.float32)
            # Fold the 1/S of the mean into the small (TB, C) logits.
            logits = logits * inv_s + b_ref[...].astype(jnp.float32)
            o_ref[...] = logits.reshape(o_ref.shape).astype(o_ref.dtype)

    return kernel


def _tpu_vmem_bytes():
    """Physical per-core VMEM; falls back to 64 MiB (smallest across
    v5e/v6e/v7x) if the query is unavailable."""
    try:
        return int(pltpu.get_tpu_info().vmem_capacity_bytes)
    except Exception:
        return 64 * 1024 * 1024


def _select_tiles(B, S, D, itemsize, target_bytes):
    """Pick (TB, TS) respecting TPU sublane packing and the x-block budget."""
    if itemsize == 1:
        align_s = 32           # int8 / fp8 pack 32 rows per sublane group
    elif itemsize == 2:
        align_s = 16           # bf16 / fp16
    else:
        align_s = 8
    # Batch tile: cap at 8 rows.  For small batches split in two so the
    # "parallel" grid axis has >= 2 steps and can shard across v7x's two
    # TensorCores.  TS grows correspondingly, so per-step block bytes (and
    # hence single-core per-step overhead) stay the same.
    if B > 8:
        TB = 8
    elif B > 1:
        TB = int(pl.cdiv(B, 2))
    else:
        TB = 1
    ts_cap = max(align_s, target_bytes // max(1, TB * D * itemsize))
    ts_cap = max(align_s, (ts_cap // align_s) * align_s)
    TS = S if S <= ts_cap else ts_cap
    return TB, TS


def classification_head(x, weight, bias, *, tb=None, ts=None):
    """x: (B, S, D) or (B, D); weight: (C, D); bias: (C,) -> (B, C) logits."""
    if x.ndim == 2:
        x = x[:, None, :]   # S = 1, mean is a no-op (matches torch 2-D path)
    B, S, D = x.shape
    C = weight.shape[0]
    w_t = jnp.transpose(weight)        # (D, C): plain (TB,D)x(D,C) contraction
    bias2d = bias.reshape(1, C)

    itemsize = jnp.dtype(x.dtype).itemsize
    phys_vmem = _tpu_vmem_bytes()
    # x-block byte budget scaled to the generation's VMEM:
    # ~8 MiB on v7x (64 MiB/TC), ~12 MiB on v5e/v6e (128 MiB).
    target_bytes = int(min(12 << 20, max(4 << 20, phys_vmem // 8)))

    auto_tb, auto_ts = _select_tiles(B, S, D, itemsize, target_bytes)
    TB = tb if tb is not None else auto_tb
    TS = ts if ts is not None else auto_ts

    grid = (pl.cdiv(B, TB), pl.cdiv(S, TS))

    # VMEM budget: double-buffered x block, resident W/bias (counted twice in
    # case single-buffering is unavailable), double-buffered output block and
    # the f32 accumulator, with 2x headroom; capped at 3/4 of physical VMEM
    # to leave room for compiler-internal scratch.
    est = (2 * TB * TS * D * itemsize
           + 2 * w_t.size * jnp.dtype(w_t.dtype).itemsize
           + 2 * bias2d.size * jnp.dtype(bias2d.dtype).itemsize
           + 2 * TB * C * itemsize
           + TB * D * 4)
    vmem_limit = int(min(max(2 * est, 16 << 20), phys_vmem * 3 // 4))

    kernel = _make_head_kernel(S, TS)

    def call(single_buffer_resident):
        resident_kwargs = (dict(pipeline_mode=pl.Buffered(1))
                           if single_buffer_resident else {})
        return pl.pallas_call(
            kernel,
            out_shape=jax.ShapeDtypeStruct((B, 1, C), x.dtype),
            grid_spec=pltpu.PrefetchScalarGridSpec(
                num_scalar_prefetch=0,
                grid=grid,
                in_specs=[
                    pl.BlockSpec((TB, TS, D), lambda i, j: (i, j, 0)),
                    pl.BlockSpec((D, C), lambda i, j: (0, 0),
                                 **resident_kwargs),       # resident weight
                    pl.BlockSpec((1, C), lambda i, j: (0, 0),
                                 **resident_kwargs),       # resident bias
                ],
                out_specs=pl.BlockSpec((TB, 1, C), lambda i, j: (i, 0, 0)),
                scratch_shapes=[pltpu.VMEM((TB, D), jnp.float32)],
            ),
            compiler_params=pltpu.CompilerParams(
                dimension_semantics=("parallel", "arbitrary"),
                vmem_limit_bytes=vmem_limit,
            ),
        )(x, w_t, bias2d)

    try:
        out = call(True)     # single-buffer the constant-index weight & bias
    except Exception:
        # pipeline_mode / Buffered(1) unsupported in this build -> default
        # double-buffering of the (small, resident) weight & bias.
        out = call(False)
    return out.reshape(B, C)


def _ref(x, weight, bias):
    if x.ndim == 3:
        x = jnp.mean(x.astype(jnp.float32), axis=1)
    return (x.astype(jnp.float32) @ weight.astype(jnp.float32).T
            + bias.astype(jnp.float32)).astype(x.dtype)


if __name__ == "__main__":
    key = jax.random.PRNGKey(0)
    kx, kw, kb, kx2, kx3, kx4 = jax.random.split(key, 6)

    # ---- Test 1: small 3-D input (module's main path; B split for megacore) ----
    B, S, D, C = 2, 8, 32, 10
    bound = 1.0 / (D ** 0.5)   # mimic nn.Linear's uniform init
    x = jax.random.normal(kx, (B, S, D), dtype=jnp.float32)
    weight = jax.random.uniform(kw, (C, D), minval=-bound, maxval=bound,
                                dtype=jnp.float32)
    bias = jax.random.uniform(kb, (C,), minval=-bound, maxval=bound,
                              dtype=jnp.float32)

    out = classification_head(x, weight, bias)
    jax.block_until_ready(out)
    assert out.shape == (B, C)
    assert jnp.allclose(out, _ref(x, weight, bias), atol=1e-5, rtol=1e-5)

    # ---- Test 2: 2-D input (no mean, matches torch) ----
    x2 = jax.random.normal(kx2, (B, D), dtype=jnp.float32)
    out2 = classification_head(x2, weight, bias)
    jax.block_until_ready(out2)
    assert out2.shape == (B, C)
    assert jnp.allclose(out2, _ref(x2, weight, bias), atol=1e-5, rtol=1e-5)

    # ---- Test 3: tiled path with a partial (masked) last S tile ----
    B3, S3, D3 = 16, 40, 128
    bound3 = 1.0 / (D3 ** 0.5)
    x3 = jax.random.normal(kx3, (B3, S3, D3), dtype=jnp.float32)
    w3 = jax.random.uniform(kw, (C, D3), minval=-bound3, maxval=bound3,
                            dtype=jnp.float32)
    b3 = jax.random.uniform(kb, (C,), minval=-bound3, maxval=bound3,
                            dtype=jnp.float32)
    out3 = classification_head(x3, w3, b3, tb=8, ts=16)   # 40 = 2*16 + 8 (partial)
    jax.block_until_ready(out3)
    assert out3.shape == (B3, C)
    assert jnp.allclose(out3, _ref(x3, w3, b3), atol=1e-4, rtol=1e-4)

    # ---- Test 4: bf16 head (native-dtype MXU operand path) ----
    B4, S4, D4, C4 = 4, 24, 128, 16
    bound4 = 1.0 / (D4 ** 0.5)
    x4 = jax.random.normal(kx4, (B4, S4, D4), dtype=jnp.float32).astype(jnp.bfloat16)
    w4 = jax.random.uniform(kw, (C4, D4), minval=-bound4, maxval=bound4,
                            dtype=jnp.float32).astype(jnp.bfloat16)
    b4 = jax.random.uniform(kb, (C4,), minval=-bound4, maxval=bound4,
                            dtype=jnp.float32).astype(jnp.bfloat16)
    out4 = classification_head(x4, w4, b4)
    jax.block_until_ready(out4)
    assert out4.shape == (B4, C4)
    assert jnp.allclose(out4.astype(jnp.float32),
                        _ref(x4, w4, b4).astype(jnp.float32),
                        atol=5e-2, rtol=5e-2)

    print("KERNEL_OK")
</pallas_src>

<mosaic_0001>
module attributes {stable_mosaic.version = 11 : i64} {
  func.func @kernel(%arg0: i32, %arg1: i32, %arg2: memref<1x8x32xf32, #tpu.memory_space<vmem>>, %arg3: memref<32x10xf32, #tpu.memory_space<vmem>>, %arg4: memref<1x10xf32, #tpu.memory_space<vmem>>, %arg5: memref<1x1x10xf32, #tpu.memory_space<vmem>>, %arg6: memref<1x32xf32, #tpu.memory_space<vmem>>) attributes {dimension_semantics = [#tpu.dimension_semantics<parallel>, #tpu.dimension_semantics<arbitrary>], iteration_bounds = array<i64: 2, 1>, scalar_prefetch = 0 : i64, scratch_operands = 1 : i64, tpu.core_type = #tpu.core_type<tc>, window_params = [{transform_indices = @transform_0, window_bounds = array<i64: 1, 8, 32>}, {pipeline_mode = #tpu.pipeline_mode<synchronous>, transform_indices = @transform_1, window_bounds = array<i64: 32, 10>}, {pipeline_mode = #tpu.pipeline_mode<synchronous>, transform_indices = @transform_2, window_bounds = array<i64: 1, 10>}, {transform_indices = @transform_3, window_bounds = array<i64: 1, 1, 10>}]} {
    %c0_i32 = arith.constant 0 : i32
    %0 = arith.cmpi eq, %arg1, %c0_i32 : i32
    %1 = arith.extui %0 : i1 to i32
    %c0_i32_0 = arith.constant 0 : i32
    %2 = arith.cmpi ne, %1, %c0_i32_0 : i32
    scf.if %2 {
      %cst_9 = arith.constant 0.000000e+00 : f32
      %11 = vector.broadcast %cst_9 : f32 to vector<1x32xf32>
      %c0_10 = arith.constant 0 : index
      %c0_11 = arith.constant 0 : index
      %12 = vector.load %arg6[%c0_10, %c0_11] : memref<1x32xf32, #tpu.memory_space<vmem>>, vector<1x32xf32>
      tpu.vector_store %arg6[%c0_10, %c0_11], %11 {strides = array<i32>} : memref<1x32xf32, #tpu.memory_space<vmem>>, vector<1x32xf32>,
    } else {
    }
    %c0 = arith.constant 0 : index
    %c0_1 = arith.constant 0 : index
    %c0_2 = arith.constant 0 : index
    %3 = vector.load %arg2[%c0, %c0_1, %c0_2] : memref<1x8x32xf32, #tpu.memory_space<vmem>>, vector<1x8x32xf32>
    %c0_3 = arith.constant 0 : index
    %c0_4 = arith.constant 0 : index
    %4 = vector.load %arg6[%c0_3, %c0_4] : memref<1x32xf32, #tpu.memory_space<vmem>>, vector<1x32xf32>
    %cst = arith.constant dense<0.000000e+00> : vector<1x32xf32>
    %5 = vector.multi_reduction <add>, %3, %cst [1] : vector<1x8x32xf32> to vector<1x32xf32>
    %6 = arith.addf %4, %5 : vector<1x32xf32>
    %c0_5 = arith.constant 0 : index
    %c0_6 = arith.constant 0 : index
    %7 = vector.load %arg6[%c0_5, %c0_6] : memref<1x32xf32, #tpu.memory_space<vmem>>, vector<1x32xf32>
    tpu.vector_store %arg6[%c0_5, %c0_6], %6 {strides = array<i32>} : memref<1x32xf32, #tpu.memory_space<vmem>>, vector<1x32xf32>,
    %c0_i32_7 = arith.constant 0 : i32
    %8 = arith.cmpi eq, %arg1, %c0_i32_7 : i32
    %9 = arith.extui %8 : i1 to i32
    %c0_i32_8 = arith.constant 0 : i32
    %10 = arith.cmpi ne, %9, %c0_i32_8 : i32
    scf.if %10 {
      %c0_9 = arith.constant 0 : index
      %c0_10 = arith.constant 0 : index
      %11 = vector.load %arg6[%c0_9, %c0_10] : memref<1x32xf32, #tpu.memory_space<vmem>>, vector<1x32xf32>
      %c0_11 = arith.constant 0 : index
      %c0_12 = arith.constant 0 : index
      %12 = vector.load %arg3[%c0_11, %c0_12] : memref<32x10xf32, #tpu.memory_space<vmem>>, vector<32x10xf32>
      %cst_13 = arith.constant dense<0.000000e+00> : vector<1x10xf32>
      %13 = tpu.matmul %11, %12, %cst_13 {dimension_numbers = #tpu.dot_dimension_numbers<[1], [0], [0], [1], [0, 0, 1, 1], [], []>} : vector<1x32xf32>, vector<32x10xf32>, vector<1x10xf32> -> vector<1x10xf32>
      %cst_14 = arith.constant 1.250000e-01 : f32
      %14 = vector.broadcast %cst_14 : f32 to vector<1x10xf32>
      %15 = arith.mulf %13, %14 : vector<1x10xf32>
      %c0_15 = arith.constant 0 : index
      %c0_16 = arith.constant 0 : index
      %16 = vector.load %arg4[%c0_15, %c0_16] : memref<1x10xf32, #tpu.memory_space<vmem>>, vector<1x10xf32>
      %17 = arith.addf %15, %16 : vector<1x10xf32>
      %18 = vector.shape_cast %17 : vector<1x10xf32> to vector<1x1x10xf32>
      %c0_17 = arith.constant 0 : index
      %c0_18 = arith.constant 0 : index
      %c0_19 = arith.constant 0 : index
      %19 = vector.load %arg5[%c0_17, %c0_18, %c0_19] : memref<1x1x10xf32, #tpu.memory_space<vmem>>, vector<1x1x10xf32>
      tpu.vector_store %arg5[%c0_17, %c0_18, %c0_19], %18 {strides = array<i32>} : memref<1x1x10xf32, #tpu.memory_space<vmem>>, vector<1x1x10xf32>,
    } else {
    }
    return
  }
  func.func @transform_0(%arg0: i32, %arg1: i32) -> (i32, i32, i32) {
    %c0_i32 = arith.constant 0 : i32
    %c0_i32_0 = arith.constant 0 : i32
    return %arg0, %arg1, %c0_i32 : i32, i32, i32
  }
  func.func @transform_1(%arg0: i32, %arg1: i32) -> (i32, i32) {
    %c0_i32 = arith.constant 0 : i32
    %c0_i32_0 = arith.constant 0 : i32
    %c0_i32_1 = arith.constant 0 : i32
    return %c0_i32, %c0_i32_0 : i32, i32
  }
  func.func @transform_2(%arg0: i32, %arg1: i32) -> (i32, i32) {
    %c0_i32 = arith.constant 0 : i32
    %c0_i32_0 = arith.constant 0 : i32
    %c0_i32_1 = arith.constant 0 : i32
    return %c0_i32, %c0_i32_0 : i32, i32
  }
  func.func @transform_3(%arg0: i32, %arg1: i32) -> (i32, i32, i32) {
    %c0_i32 = arith.constant 0 : i32
    %c0_i32_0 = arith.constant 0 : i32
    %c0_i32_1 = arith.constant 0 : i32
    return %arg0, %c0_i32, %c0_i32_0 : i32, i32, i32
  }
}

module attributes {stable_mosaic.version = 11 : i64} {
  func.func @kernel(%arg0: i32, %arg1: i32, %arg2: memref<1x8x32xf32, #tpu.memory_space<vmem>>, %arg3: memref<32x10xf32, #tpu.memory_space<vmem>>, %arg4: memref<1x10xf32, #tpu.memory_space<vmem>>, %arg5: memref<1x1x10xf32, #tpu.memory_space<vmem>>, %arg6: memref<1x32xf32, #tpu.memory_space<vmem>>) attributes {dimension_semantics = [#tpu.dimension_semantics<parallel>, #tpu.dimension_semantics<arbitrary>], iteration_bounds = array<i64: 2, 1>, scalar_prefetch = 0 : i64, scratch_operands = 1 : i64, tpu.core_type = #tpu.core_type<tc>, window_params = [{transform_indices = @transform_0, window_bounds = array<i64: 1, 8, 32>}, {pipeline_mode = #tpu.pipeline_mode<synchronous>, transform_indices = @transform_1, window_bounds = array<i64: 32, 10>}, {pipeline_mode = #tpu.pipeline_mode<synchronous>, transform_indices = @transform_2, window_bounds = array<i64: 1, 10>}, {transform_indices = @transform_3, window_bounds = array<i64: 1, 1, 10>}]} {
    %c0_i32 = arith.constant 0 : i32
    %0 = arith.cmpi eq, %arg1, %c0_i32 : i32
    %1 = arith.extui %0 : i1 to i32
    %c0_i32_0 = arith.constant 0 : i32
    %2 = arith.cmpi ne, %1, %c0_i32_0 : i32
    scf.if %2 {
      %cst_9 = arith.constant 0.000000e+00 : f32
      %11 = vector.broadcast %cst_9 : f32 to vector<1x32xf32>
      %c0_10 = arith.constant 0 : index
      %c0_11 = arith.constant 0 : index
      %12 = vector.load %arg6[%c0_10, %c0_11] : memref<1x32xf32, #tpu.memory_space<vmem>>, vector<1x32xf32>
      tpu.vector_store %arg6[%c0_10, %c0_11], %11 {strides = array<i32>} : memref<1x32xf32, #tpu.memory_space<vmem>>, vector<1x32xf32>,
    } else {
    }
    %c0 = arith.constant 0 : index
    %c0_1 = arith.constant 0 : index
    %c0_2 = arith.constant 0 : index
    %3 = vector.load %arg2[%c0, %c0_1, %c0_2] : memref<1x8x32xf32, #tpu.memory_space<vmem>>, vector<1x8x32xf32>
    %c0_3 = arith.constant 0 : index
    %c0_4 = arith.constant 0 : index
    %4 = vector.load %arg6[%c0_3, %c0_4] : memref<1x32xf32, #tpu.memory_space<vmem>>, vector<1x32xf32>
    %cst = arith.constant dense<0.000000e+00> : vector<1x32xf32>
    %5 = vector.multi_reduction <add>, %3, %cst [1] : vector<1x8x32xf32> to vector<1x32xf32>
    %6 = arith.addf %4, %5 : vector<1x32xf32>
    %c0_5 = arith.constant 0 : index
    %c0_6 = arith.constant 0 : index
    %7 = vector.load %arg6[%c0_5, %c0_6] : memref<1x32xf32, #tpu.memory_space<vmem>>, vector<1x32xf32>
    tpu.vector_store %arg6[%c0_5, %c0_6], %6 {strides = array<i32>} : memref<1x32xf32, #tpu.memory_space<vmem>>, vector<1x32xf32>,
    %c0_i32_7 = arith.constant 0 : i32
    %8 = arith.cmpi eq, %arg1, %c0_i32_7 : i32
    %9 = arith.extui %8 : i1 to i32
    %c0_i32_8 = arith.constant 0 : i32
    %10 = arith.cmpi ne, %9, %c0_i32_8 : i32
    scf.if %10 {
      %c0_9 = arith.constant 0 : index
      %c0_10 = arith.constant 0 : index
      %11 = vector.load %arg6[%c0_9, %c0_10] : memref<1x32xf32, #tpu.memory_space<vmem>>, vector<1x32xf32>
      %c0_11 = arith.constant 0 : index
      %c0_12 = arith.constant 0 : index
      %12 = vector.load %arg3[%c0_11, %c0_12] : memref<32x10xf32, #tpu.memory_space<vmem>>, vector<32x10xf32>
      %cst_13 = arith.constant dense<0.000000e+00> : vector<1x10xf32>
      %13 = tpu.matmul %11, %12, %cst_13 {dimension_numbers = #tpu.dot_dimension_numbers<[1], [0], [0], [1], [0, 0, 1, 1], [], []>} : vector<1x32xf32>, vector<32x10xf32>, vector<1x10xf32> -> vector<1x10xf32>
      %cst_14 = arith.constant 1.250000e-01 : f32
      %14 = vector.broadcast %cst_14 : f32 to vector<1x10xf32>
      %15 = arith.mulf %13, %14 : vector<1x10xf32>
      %c0_15 = arith.constant 0 : index
      %c0_16 = arith.constant 0 : index
      %16 = vector.load %arg4[%c0_15, %c0_16] : memref<1x10xf32, #tpu.memory_space<vmem>>, vector<1x10xf32>
      %17 = arith.addf %15, %16 : vector<1x10xf32>
      %18 = vector.shape_cast %17 : vector<1x10xf32> to vector<1x1x10xf32>
      %c0_17 = arith.constant 0 : index
      %c0_18 = arith.constant 0 : index
      %c0_19 = arith.constant 0 : index
      %19 = vector.load %arg5[%c0_17, %c0_18, %c0_19] : memref<1x1x10xf32, #tpu.memory_space<vmem>>, vector<1x1x10xf32>
      tpu.vector_store %arg5[%c0_17, %c0_18, %c0_19], %18 {strides = array<i32>} : memref<1x1x10xf32, #tpu.memory_space<vmem>>, vector<1x1x10xf32>,
    } else {
    }
    return
  }
  func.func @transform_0(%arg0: i32, %arg1: i32) -> (i32, i32, i32) {
    %c0_i32 = arith.constant 0 : i32
    %c0_i32_0 = arith.constant 0 : i32
    return %arg0, %arg1, %c0_i32 : i32, i32, i32
  }
  func.func @transform_1(%arg0: i32, %arg1: i32) -> (i32, i32) {
    %c0_i32 = arith.constant 0 : i32
    %c0_i32_0 = arith.constant 0 : i32
    %c0_i32_1 = arith.constant 0 : i32
    return %c0_i32, %c0_i32_0 : i32, i32
  }
  func.func @transform_2(%arg0: i32, %arg1: i32) -> (i32, i32) {
    %c0_i32 = arith.constant 0 : i32
    %c0_i32_0 = arith.constant 0 : i32
    %c0_i32_1 = arith.constant 0 : i32
    return %c0_i32, %c0_i32_0 : i32, i32
  }
  func.func @transform_3(%arg0: i32, %arg1: i32) -> (i32, i32, i32) {
    %c0_i32 = arith.constant 0 : i32
    %c0_i32_0 = arith.constant 0 : i32
    %c0_i32_1 = arith.constant 0 : i32
    return %arg0, %c0_i32, %c0_i32_0 : i32, i32, i32
  }
}

</mosaic_0001>

<bundles_post_ra>
// kernel: tpu_custom_call.1
= control target key start
LH: loop header
LB: loop body
LE: loop exit
PB: predicated region body
PF: predicated region fallthrough
CT: control target
= control target key end

     0   :  { %8 = vsyncpa [#allocation4], 0  ;;  %s695_s0 = inlined_call_operand.vmem [shape: f32[2,8,32], index: 0, kind: input, shape index: {}]   ;;  %s696_s1 = inlined_call_operand.vmem [shape: f32[32,10], index: 1, kind: input, shape index: {}]   ;;  %s697_s2 = inlined_call_operand.vmem [shape: f32[1,10], index: 2, kind: input, shape index: {}]   ;;  %s698_s3 = inlined_call_operand.hbm [shape: f32[2,1,10], index: 3, kind: output, shape index: {}]  }
   0x1   :  { %10 = vsyncpa [#allocation4 + $0x1], 0  ;;  %s566_s12 = smov 0   ;;  %s568_s13 = smov 0  }
   0x2   :  { %s570_s14 = smov 0   ;;  %s572_s15 = smov 0  }
   0x3   :  { %s574_s16 = smov 0   ;;  %s576_s17 = smov 0  }
   0x4 LB: > { %s372_s18 = sadd.s32 4294967295, %s540_s17   ;;  %s373_s19 = sadd.s32 4294967294, %s540_s17   ;;  %s540_s17 = sphi %s576_s17, %s16_s17   ;;  %s536_s16 = sphi %s574_s16, %s705_s16   ;;  %s532_s15 = sphi %s572_s15, %s704_s15   ;;  %s528_s14 = sphi %s570_s14, %s703_s14   ;;  %s524_s13 = sphi %s568_s13, %s702_s13   ;;  %s520_s12 = sphi %s566_s12, %s701_s12  }
   0x5   : > { %s28_s20 = sadd.s32 1, %s536_s16  ;;  %s105_s21 = sadd.s32 1, %s528_s14 }
   0x6   : > { %p30_p0 = scmp.ge.s32.totalorder %s28_s20, 2  ;;  %p115_p1 = scmp.ne.s32.totalorder %s528_s14, %s524_s13 }
   0x7   : > { %p116_p2 = scmp.eq.s32.totalorder %s372_s18, 1  ;;  %p121_p3 = scmp.ne.s32.totalorder %s524_s13, %s520_s12 }
   0x8   : > { %s707_s20 = smov (%p30_p0, %s28_s20), 0  ;;  %p122_p5 = scmp.eq.s32.totalorder %s373_s19, 1 }
   0x9   : > { %p606_p4 = por %p116_p2, %p115_p1  ;;  %s102_s23 = ssub.s32 %s536_s16, %s707_s20 }
   0xa   : > { %p376_p6 = scmp.ge.s32.totalorder %s540_s17, 1  ;;  %p103_p7 = scmp.eq.s32.totalorder %s102_s23, 0 }
   0xb   : > { %p613_p8 = por %p122_p5, %p121_p3  ;;  %p156_p9 = scmp.lt.s32.totalorder %s540_s17, 3 }
   0xc   : > { %s619_s25 = scalar_select %p103_p7, %s528_s14, %s105_s21  }
   0xd   : > { %p157_p10 = pnand %p376_p6, %p156_p9 }
   0xe   : > { %v211_v0 = vld [vmem:[%s696_s1] sm:$0xff] (!%p157_p10)  ;;  %v212_v1 = vld [vmem:[%s696_s1 + $0x8] sm:$0xff] (!%p157_p10)  ;;  %v213_v2 = vld [vmem:[%s696_s1 + $0x10] sm:$0xff] (!%p157_p10)  ;;  %vm192_vm0 = vcmask (!%p157_p10), 253952   ;;  %v542_v3 = vmov (!%p157_p10), 0.0|0.0   ;;  %v543_v6 = vmov (!%p157_p10), 0.0  }
   0xf   : > { %160 = sbr.rel (%p157_p10) target bundleno = 280 (0x118), region = 32  ;;  %398 = vmatprep.subr.bf16.mxu0 (!%p157_p10), %v542_v3  ;;  %v399_v4 = vpack.c.bf16 (!%p157_p10), %v212_v1, %v211_v0  ;;  %v214_v5 = vld [vmem:[%s696_s1 + $0x18] sm:$0xff] (!%p157_p10)  ;;  %193 = vst.msk [vmem:[#allocation2] sm:$0x1] (!%p157_p10), %vm192_vm0, %v543_v6  ;;  %p181_p11 = scmp.lt.s32.totalorder (!%p157_p10), %s532_s15, 1  ;;  %vm544_vm1 = vmmov (!%p157_p10), 0  }
  0x10   : > { %395 = vmatprep.mubr.msk.f32.mxu0 (!%p157_p10), %vm544_vm1, %v543_v6  ;;  %v402_v7 = vpack.c.bf16 (!%p157_p10), %v214_v5, %v213_v2  ;;  %vm196_vm2 = vcmask (!%p157_p10), 261120   ;;  %s179_s18 = sand.u32 (!%p157_p10), 1, %s524_s13   ;;  %v289_v20 = vld [vmem:[%s697_s2] sm:$0x1] (!%p157_p10)  ;;  %s379_s23 = sshll.u32 (!%p157_p10), %s532_s15, 4  ;;  %vm291_vm3 = vcmask (!%p157_p10), 73728  }
  0x11   : > { %400 = vmatpush3.bf16.msra.mxu0 (!%p157_p10), %v399_v4  ;;  %s180_s26 = scalar_lea.vmem (!%p157_p10), [#allocation3], %s179_s18  ;;  %s648_s30 = scalar_lea.hbm (!%p157_p10), %s698_s3, %s379_s23 }
  0x12   : > { %401 = vmatprep.subr.bf16.mxu0 (!%p157_p10), %v542_v3  ;;  %s306_s27 = sshll.u32 (!%p157_p10), %s180_s26, 4  ;;  %s294_s4 = scalar_lea.sflag (!%p157_p10), [#allocation4], %s179_s18  ;;  %s650_s27 = int_to_ptr.vmem [resolvable:$true] %s306_s27 }
  0x13   : > { %s462_s5 = scalar_lea.vmem (!%p157_p10), %s650_s27, 16 }
  0x14   : > { %p463_p12 = scmp.ne.s32.totalorder (!%p157_p10), %s650_s27, %s462_s5 }
  0x15   : > { %403 = vmatpush3.bf16.msra.mxu0 (!%p157_p10), %v402_v7 }
  0x16   : > { %s182_s7 = scalar_select %p181_p11, %s532_s15, 1  ;;  %v195_v15 = vld [vmem:[#allocation2] sm:$0x1] }
  0x17   : > { %p464_p13 = pnand %p463_p12, %p606_p4  ;;  %s545_s15 = smov [#allocation3]  }
  0x18   : > { %s377_s8 = sshll.u32 %s182_s7, 3  ;;  %s466_s6 = sshll.u32 %s545_s15, 4  ;;  %s467_s6 = int_to_ptr.vmem [resolvable:$false] %s466_s6 }
  0x19   : > { %s187_s11 = scalar_lea.vmem %s695_s0, %s377_s8  ;;  %p465_p0 = pneg %p464_p13 }
  0x1a   : > { %v194_v8 = vld [vmem:[%s187_s11] sm:$0xff]  ;;  %s468_s7 = scalar_lea.vmem %s467_s6, 32  ;;  %p469_p1 = scmp.lt.s32.totalorder %s650_s27, %s467_s6 }
  0x1b   : > { %v197_v9 = vsel %vm196_vm2, %v194_v8, 0.0  ;;  %p470_p2 = scmp.lt.s32.totalorder %s468_s7, %s462_s5 }
  0x1c   : > { %v198_v10 = vrot.slane %v197_v9, 4 }
  0x1d   : > { %p471_p3 = por %p470_p2, %p469_p1 }
  0x1e   : > { %v199_v11 = vadd.f32 %v198_v10, %v197_v9 }
  0x1f   : > { %p472_p5 = pnand %p471_p3, %p465_p0 }
  0x20   : > { %v200_v12 = vrot.slane %v199_v11, 2 }
  0x22   : > { %v201_v13 = vadd.f32 %v200_v12, %v199_v11 }
  0x24   : > { %v202_v14 = vrot.slane %v201_v13, 1 }
  0x26   : > { %v203_v16 = vadd.f32 %v202_v14, %v201_v13 }
  0x28   : > { %v204_v17 = vadd.f32 %v203_v16, %v195_v15 }
  0x2a   : > { %206 = vst.msk [vmem:[#allocation2] sm:$0x1] %vm192_vm0, %v204_v17 }
  0x31   : > { %v210_v18 = vld [vmem:[#allocation2] sm:$0x1] }
  0x32   : > { %396 = vmatmul.mubr.msk.f32.vlgmr.msra.gmra.mrb[0].mxu0 %vm196_vm2, %v210_v18 }
 0x105   : > { %v284_v19 = vpop.f32.mrb[0].mxu0 }
 0x106   : > { %v288_v21 = vmul.f32 0.125, %v284_v19  ;;  %v397_v22 = vpop.f32.mrb[1].mxu0 }
 0x108   : > { %v290_v23 = vadd.f32 %v289_v20, %v288_v21 }
 0x10a   : > { %292 = vst.msk [vmem:[%s180_s26] sm:$0x1] %vm291_vm3, %v290_v23 }
 0x10b   : > { %475 = shalt.err (!%p472_p5)
}
 0x10c   : > { %s476_s8 = scalar_lea.hbm %s648_s30, 16  ;;  %s480_s11 = scalar_lea.hbm %s698_s3, 32 }
 0x10d   : > { %p477_p6 = scmp.ne.s32.totalorder %s648_s30, %s476_s8  ;;  %p481_p10 = scmp.lt.u32.totalorder %s648_s30, %s698_s3 }
 0x10e   : > { %p482_p11 = scmp.lt.u32.totalorder %s480_s11, %s476_s8  ;;  %p484_p13 = scmp.lt.u32.totalorder %s476_s8, %s648_s30 }
 0x10f   : > { %p478_p7 = pnand %p477_p6, %p606_p4 }
 0x110   : > { %p483_p12 = por %p482_p11, %p481_p10 }
 0x111   : > { %p479_p9 = pneg %p478_p7 }
 0x112   : > { %p485_p0 = por %p484_p13, %p483_p12 }
 0x114   : > { %p486_p1 = pnand %p485_p0, %p479_p9 }
 0x116   : > { %489 = shalt.err (!%p486_p1)
}
 0x117   : > { %404 = dma.vmem_to_hbm [thread:$0]  (%p606_p4), %s650_s27, 16, %s648_s30, %s294_s4  }
 0x118 PF: > { %p410_p2 = scmp.ge.s32.totalorder %s540_s17, 2  ;;  %s318_s21 = sand.u32 1, %s520_s12  }
 0x119   : > { %s319_s23 = scalar_lea.sflag [#allocation4], %s318_s21 }
 0x11a   : > { %p407_p3 = pnand %p410_p2, %p613_p8 }
 0x11c   : > { %515 = dma.done.wait (!%p407_p3), %s319_s23, 16  }
 0x11d   : > { %517 = vsyncadd (!%p407_p3), %s319_s23, 4294967280  ;;  %s16_s17 = sadd.s32 1, %s540_s17   ;;  %s701_s12 = smov %s524_s13 }
 0x11e   : > { %p13_p5 = scmp.ge.s32.totalorder %s16_s17, 4   ;;  %s702_s13 = smov %s528_s14 }
 0x11f   : > { %s703_s14 = smov %s619_s25  ;;  %s704_s15 = smov %s536_s16 }
 0x120   : > { %s705_s16 = smov %s707_s20  ;;  %15 = sbr.rel (!%p13_p5) target bundleno = 4 (0x4), region = 75 }
 0x127   :  { %323 = vsyncpa [#allocation4], 1 }
 0x128   :  { %325 = vsyncpa [#allocation4 + $0x1], 1 }

// kernel: tpu_custom_call.1
= control target key start
LH: loop header
LB: loop body
LE: loop exit
PB: predicated region body
PF: predicated region fallthrough
CT: control target
= control target key end

     0   :  { %8 = vsyncpa [#allocation4], 0  ;;  %s695_s0 = inlined_call_operand.vmem [shape: f32[2,8,32], index: 0, kind: input, shape index: {}]   ;;  %s696_s1 = inlined_call_operand.vmem [shape: f32[32,10], index: 1, kind: input, shape index: {}]   ;;  %s697_s2 = inlined_call_operand.vmem [shape: f32[1,10], index: 2, kind: input, shape index: {}]   ;;  %s698_s3 = inlined_call_operand.hbm [shape: f32[2,1,10], index: 3, kind: output, shape index: {}]  }
   0x1   :  { %10 = vsyncpa [#allocation4 + $0x1], 0  ;;  %s566_s12 = smov 0   ;;  %s568_s13 = smov 0  }
   0x2   :  { %s570_s14 = smov 0   ;;  %s572_s15 = smov 0  }
   0x3   :  { %s574_s16 = smov 0   ;;  %s576_s17 = smov 0  }
   0x4 LB: > { %s372_s18 = sadd.s32 4294967295, %s540_s17   ;;  %s373_s19 = sadd.s32 4294967294, %s540_s17   ;;  %s540_s17 = sphi %s576_s17, %s16_s17   ;;  %s536_s16 = sphi %s574_s16, %s705_s16   ;;  %s532_s15 = sphi %s572_s15, %s704_s15   ;;  %s528_s14 = sphi %s570_s14, %s703_s14   ;;  %s524_s13 = sphi %s568_s13, %s702_s13   ;;  %s520_s12 = sphi %s566_s12, %s701_s12  }
   0x5   : > { %s28_s20 = sadd.s32 1, %s536_s16  ;;  %s105_s21 = sadd.s32 1, %s528_s14 }
   0x6   : > { %p30_p0 = scmp.ge.s32.totalorder %s28_s20, 2  ;;  %p115_p1 = scmp.ne.s32.totalorder %s528_s14, %s524_s13 }
   0x7   : > { %p116_p2 = scmp.eq.s32.totalorder %s372_s18, 1  ;;  %p121_p3 = scmp.ne.s32.totalorder %s524_s13, %s520_s12 }
   0x8   : > { %s707_s20 = smov (%p30_p0, %s28_s20), 0  ;;  %p122_p5 = scmp.eq.s32.totalorder %s373_s19, 1 }
   0x9   : > { %p606_p4 = por %p116_p2, %p115_p1  ;;  %s102_s23 = ssub.s32 %s536_s16, %s707_s20 }
   0xa   : > { %p376_p6 = scmp.ge.s32.totalorder %s540_s17, 1  ;;  %p103_p7 = scmp.eq.s32.totalorder %s102_s23, 0 }
   0xb   : > { %p613_p8 = por %p122_p5, %p121_p3  ;;  %p156_p9 = scmp.lt.s32.totalorder %s540_s17, 3 }
   0xc   : > { %s619_s25 = scalar_select %p103_p7, %s528_s14, %s105_s21  }
   0xd   : > { %p157_p10 = pnand %p376_p6, %p156_p9 }
   0xe   : > { %v211_v0 = vld [vmem:[%s696_s1] sm:$0xff] (!%p157_p10)  ;;  %v212_v1 = vld [vmem:[%s696_s1 + $0x8] sm:$0xff] (!%p157_p10)  ;;  %v213_v2 = vld [vmem:[%s696_s1 + $0x10] sm:$0xff] (!%p157_p10)  ;;  %vm192_vm0 = vcmask (!%p157_p10), 253952   ;;  %v542_v3 = vmov (!%p157_p10), 0.0|0.0   ;;  %v543_v6 = vmov (!%p157_p10), 0.0  }
   0xf   : > { %160 = sbr.rel (%p157_p10) target bundleno = 280 (0x118), region = 32  ;;  %398 = vmatprep.subr.bf16.mxu0 (!%p157_p10), %v542_v3  ;;  %v399_v4 = vpack.c.bf16 (!%p157_p10), %v212_v1, %v211_v0  ;;  %v214_v5 = vld [vmem:[%s696_s1 + $0x18] sm:$0xff] (!%p157_p10)  ;;  %193 = vst.msk [vmem:[#allocation2] sm:$0x1] (!%p157_p10), %vm192_vm0, %v543_v6  ;;  %p181_p11 = scmp.lt.s32.totalorder (!%p157_p10), %s532_s15, 1  ;;  %vm544_vm1 = vmmov (!%p157_p10), 0  }
  0x10   : > { %395 = vmatprep.mubr.msk.f32.mxu0 (!%p157_p10), %vm544_vm1, %v543_v6  ;;  %v402_v7 = vpack.c.bf16 (!%p157_p10), %v214_v5, %v213_v2  ;;  %vm196_vm2 = vcmask (!%p157_p10), 261120   ;;  %s179_s18 = sand.u32 (!%p157_p10), 1, %s524_s13   ;;  %v289_v20 = vld [vmem:[%s697_s2] sm:$0x1] (!%p157_p10)  ;;  %s379_s23 = sshll.u32 (!%p157_p10), %s532_s15, 4  ;;  %vm291_vm3 = vcmask (!%p157_p10), 73728  }
  0x11   : > { %400 = vmatpush3.bf16.msra.mxu0 (!%p157_p10), %v399_v4  ;;  %s180_s26 = scalar_lea.vmem (!%p157_p10), [#allocation3], %s179_s18  ;;  %s648_s30 = scalar_lea.hbm (!%p157_p10), %s698_s3, %s379_s23 }
  0x12   : > { %401 = vmatprep.subr.bf16.mxu0 (!%p157_p10), %v542_v3  ;;  %s306_s27 = sshll.u32 (!%p157_p10), %s180_s26, 4  ;;  %s294_s4 = scalar_lea.sflag (!%p157_p10), [#allocation4], %s179_s18  ;;  %s650_s27 = int_to_ptr.vmem [resolvable:$true] %s306_s27 }
  0x13   : > { %s462_s5 = scalar_lea.vmem (!%p157_p10), %s650_s27, 16 }
  0x14   : > { %p463_p12 = scmp.ne.s32.totalorder (!%p157_p10), %s650_s27, %s462_s5 }
  0x15   : > { %403 = vmatpush3.bf16.msra.mxu0 (!%p157_p10), %v402_v7 }
  0x16   : > { %s182_s7 = scalar_select %p181_p11, %s532_s15, 1  ;;  %v195_v15 = vld [vmem:[#allocation2] sm:$0x1] }
  0x17   : > { %p464_p13 = pnand %p463_p12, %p606_p4  ;;  %s545_s15 = smov [#allocation3]  }
  0x18   : > { %s377_s8 = sshll.u32 %s182_s7, 3  ;;  %s466_s6 = sshll.u32 %s545_s15, 4  ;;  %s467_s6 = int_to_ptr.vmem [resolvable:$false] %s466_s6 }
  0x19   : > { %s187_s11 = scalar_lea.vmem %s695_s0, %s377_s8  ;;  %p465_p0 = pneg %p464_p13 }
  0x1a   : > { %v194_v8 = vld [vmem:[%s187_s11] sm:$0xff]  ;;  %s468_s7 = scalar_lea.vmem %s467_s6, 32  ;;  %p469_p1 = scmp.lt.s32.totalorder %s650_s27, %s467_s6 }
  0x1b   : > { %v197_v9 = vsel %vm196_vm2, %v194_v8, 0.0  ;;  %p470_p2 = scmp.lt.s32.totalorder %s468_s7, %s462_s5 }
  0x1c   : > { %v198_v10 = vrot.slane %v197_v9, 4 }
  0x1d   : > { %p471_p3 = por %p470_p2, %p469_p1 }
  0x1e   : > { %v199_v11 = vadd.f32 %v198_v10, %v197_v9 }
  0x1f   : > { %p472_p5 = pnand %p471_p3, %p465_p0 }
  0x20   : > { %v200_v12 = vrot.slane %v199_v11, 2 }
  0x22   : > { %v201_v13 = vadd.f32 %v200_v12, %v199_v11 }
  0x24   : > { %v202_v14 = vrot.slane %v201_v13, 1 }
  0x26   : > { %v203_v16 = vadd.f32 %v202_v14, %v201_v13 }
  0x28   : > { %v204_v17 = vadd.f32 %v203_v16, %v195_v15 }
  0x2a   : > { %206 = vst.msk [vmem:[#allocation2] sm:$0x1] %vm192_vm0, %v204_v17 }
  0x31   : > { %v210_v18 = vld [vmem:[#allocation2] sm:$0x1] }
  0x32   : > { %396 = vmatmul.mubr.msk.f32.vlgmr.msra.gmra.mrb[0].mxu0 %vm196_vm2, %v210_v18 }
 0x105   : > { %v284_v19 = vpop.f32.mrb[0].mxu0 }
 0x106   : > { %v288_v21 = vmul.f32 0.125, %v284_v19  ;;  %v397_v22 = vpop.f32.mrb[1].mxu0 }
 0x108   : > { %v290_v23 = vadd.f32 %v289_v20, %v288_v21 }
 0x10a   : > { %292 = vst.msk [vmem:[%s180_s26] sm:$0x1] %vm291_vm3, %v290_v23 }
 0x10b   : > { %475 = shalt.err (!%p472_p5)
}
 0x10c   : > { %s476_s8 = scalar_lea.hbm %s648_s30, 16  ;;  %s480_s11 = scalar_lea.hbm %s698_s3, 32 }
 0x10d   : > { %p477_p6 = scmp.ne.s32.totalorder %s648_s30, %s476_s8  ;;  %p481_p10 = scmp.lt.u32.totalorder %s648_s30, %s698_s3 }
 0x10e   : > { %p482_p11 = scmp.lt.u32.totalorder %s480_s11, %s476_s8  ;;  %p484_p13 = scmp.lt.u32.totalorder %s476_s8, %s648_s30 }
 0x10f   : > { %p478_p7 = pnand %p477_p6, %p606_p4 }
 0x110   : > { %p483_p12 = por %p482_p11, %p481_p10 }
 0x111   : > { %p479_p9 = pneg %p478_p7 }
 0x112   : > { %p485_p0 = por %p484_p13, %p483_p12 }
 0x114   : > { %p486_p1 = pnand %p485_p0, %p479_p9 }
 0x116   : > { %489 = shalt.err (!%p486_p1)
}
 0x117   : > { %404 = dma.vmem_to_hbm [thread:$0]  (%p606_p4), %s650_s27, 16, %s648_s30, %s294_s4  }
 0x118 PF: > { %p410_p2 = scmp.ge.s32.totalorder %s540_s17, 2  ;;  %s318_s21 = sand.u32 1, %s520_s12  }
 0x119   : > { %s319_s23 = scalar_lea.sflag [#allocation4], %s318_s21 }
 0x11a   : > { %p407_p3 = pnand %p410_p2, %p613_p8 }
 0x11c   : > { %515 = dma.done.wait (!%p407_p3), %s319_s23, 16  }
 0x11d   : > { %517 = vsyncadd (!%p407_p3), %s319_s23, 4294967280  ;;  %s16_s17 = sadd.s32 1, %s540_s17   ;;  %s701_s12 = smov %s524_s13 }
 0x11e   : > { %p13_p5 = scmp.ge.s32.totalorder %s16_s17, 4   ;;  %s702_s13 = smov %s528_s14 }
 0x11f   : > { %s703_s14 = smov %s619_s25  ;;  %s704_s15 = smov %s536_s16 }
 0x120   : > { %s705_s16 = smov %s707_s20  ;;  %15 = sbr.rel (!%p13_p5) target bundleno = 4 (0x4), region = 75 }
 0x127   :  { %323 = vsyncpa [#allocation4], 1 }
 0x128   :  { %325 = vsyncpa [#allocation4 + $0x1], 1 }

</bundles_post_ra>
